<compile_context>
chip_gen: v5e
topology: v5e:2x2
jax: 0.10.0
libtpu: 0.0.40
codegen_flags: <defaults>
</compile_context>

<pallas_src>
import functools

import jax
import jax.numpy as jnp
from jax import lax
from jax.experimental import pallas as pl
from jax.experimental.pallas import tpu as pltpu

LANES = 128
SUBLANES = 8
TARGET_TILE_BYTES = 4 << 20    # per-input, per-grid-step DMA size (~4 MiB)
SPLIT_MIN_BYTES = 8 << 20      # total bytes (both inputs) before 2-way TC split
VMEM_LIMIT_BYTES = 40 << 20    # 16 MiB double-buffered inputs + headroom


def _rmse_partial_kernel(z_ref, c_ref, out_ref, acc_ref, *,
                         steps_per_split, rows_per_tile, valid_rows,
                         need_mask, last_block, fold_sublanes):
    s = pl.program_id(1)   # reduction step within this split

    @pl.when(s == 0)
    def _init():
        acc_ref[...] = jnp.zeros_like(acc_ref)

    d = z_ref[...].astype(jnp.float32) - c_ref[...].astype(jnp.float32)
    sq = d * d

    if fold_sublanes:
        # Fold the (rows_per_tile, 128) tile into the (8, 128) accumulator with
        # pure vreg adds along sublane groups (free reshape, no XLU).
        groups = rows_per_tile // SUBLANES
        if need_mask:
            blk = pl.program_id(0) * steps_per_split + s

            @pl.when(blk >= last_block)   # tail block / clamped duplicate only
            def _tail():
                row_ids = blk * rows_per_tile + lax.broadcasted_iota(
                    jnp.int32, (rows_per_tile, LANES), 0)
                sq_m = jnp.where(row_ids < valid_rows, sq, 0.0)
                acc_ref[...] += sq_m.reshape(groups, SUBLANES, LANES).sum(axis=0)

            @pl.when(blk < last_block)    # interior blocks: no mask cost
            def _interior():
                acc_ref[...] += sq.reshape(groups, SUBLANES, LANES).sum(axis=0)
        else:
            acc_ref[...] += sq.reshape(groups, SUBLANES, LANES).sum(axis=0)
    else:
        # Tiny single-block case only (rows_per_tile == rows, not 8-aligned):
        # one cross-sublane reduce into the first accumulator row.
        acc_ref[0:1, :] += jnp.sum(sq, axis=0, keepdims=True)

    @pl.when(s == steps_per_split - 1)
    def _finalize():
        out_ref[0] = acc_ref[...]


def svm_loss(z1, c1, *, tile_bytes=TARGET_TILE_BYTES,
             split_min_bytes=SPLIT_MIN_BYTES):
    """sqrt(mean((z1 - c1)**2)) via a Pallas TPU streaming reduction."""
    assert z1.shape == c1.shape, "z1 / c1 must have the same shape"
    total = z1.size
    assert total > 0

    zf = jnp.ravel(z1)
    cf = jnp.ravel(c1)
    z_item = jnp.dtype(z1.dtype).itemsize
    c_item = jnp.dtype(c1.dtype).itemsize
    itemsize = max(z_item, c_item)

    rows = total // LANES
    lane_rem = total - rows * LANES
    tail_sum = jnp.float32(0.0)

    if rows == 0:
        # Whole input is < 128 elements: a <512 B zero-pad is negligible and
        # contributes nothing to the sum (divisor stays `total`).
        zf = jnp.pad(zf, (0, LANES - total))
        cf = jnp.pad(cf, (0, LANES - total))
        rows, lane_rem = 1, 0
    elif lane_rem:
        # <128-element ragged lane tail: reduce it in the wrapper instead of
        # padding/copying the whole flattened arrays.
        zt = lax.slice(zf, (rows * LANES,), (total,)).astype(jnp.float32)
        ct = lax.slice(cf, (rows * LANES,), (total,)).astype(jnp.float32)
        tail_sum = jnp.sum((zt - ct) * (zt - ct))
        # TODO(synk): this prefix slice may still materialize a copy for the
        # custom-call operand when total % 128 != 0; lane-aligned inputs
        # (the common case) stream with zero extra copies.
        zf = lax.slice(zf, (0,), (rows * LANES,))
        cf = lax.slice(cf, (0,), (rows * LANES,))

    zf = zf.reshape(rows, LANES)
    cf = cf.reshape(rows, LANES)

    # Tile sizing by bytes: ~tile_bytes of the NATIVE dtype per input per step.
    rows_cap = max(SUBLANES, (tile_bytes // (LANES * itemsize))
                   // SUBLANES * SUBLANES)
    rows_per_tile = rows if rows <= rows_cap else rows_cap
    fold_sublanes = (rows_per_tile % SUBLANES == 0)
    total_blocks = -(-rows // rows_per_tile)
    last_block = total_blocks - 1

    # 2-way row split -> both TensorCores on v7x (free serial loop on 1-TC
    # chips); gated on bytes so medium inputs still use both DMA paths.
    input_bytes = total * (z_item + c_item)
    num_splits = 2 if (total_blocks >= 2 and input_bytes >= split_min_bytes) else 1
    steps_per_split = -(-total_blocks // num_splits)
    # Mask only when the grid over-covers the rows (ragged last block and/or
    # clamped duplicate blocks from the 2-way split rounding).
    need_mask = (num_splits * steps_per_split * rows_per_tile) != rows

    def in_map(p, s):
        return (jnp.minimum(p * steps_per_split + s, last_block), 0)

    kernel = functools.partial(
        _rmse_partial_kernel,
        steps_per_split=steps_per_split,
        rows_per_tile=rows_per_tile,
        valid_rows=rows,
        need_mask=need_mask,
        last_block=last_block,
        fold_sublanes=fold_sublanes,
    )

    cost = pl.CostEstimate(
        flops=3 * total,
        transcendentals=0,
        bytes_accessed=int(input_bytes) + num_splits * SUBLANES * LANES * 4,
    )

    partials = pl.pallas_call(
        kernel,
        out_shape=jax.ShapeDtypeStruct((num_splits, SUBLANES, LANES), jnp.float32),
        grid_spec=pltpu.PrefetchScalarGridSpec(
            num_scalar_prefetch=0,
            grid=(num_splits, steps_per_split),
            in_specs=[
                pl.BlockSpec((rows_per_tile, LANES), in_map),
                pl.BlockSpec((rows_per_tile, LANES), in_map),
            ],
            out_specs=pl.BlockSpec((1, SUBLANES, LANES), lambda p, s: (p, 0, 0)),
            scratch_shapes=[pltpu.VMEM((SUBLANES, LANES), jnp.float32)],
        ),
        compiler_params=pltpu.CompilerParams(
            dimension_semantics=("parallel", "arbitrary"),
            vmem_limit_bytes=VMEM_LIMIT_BYTES,
        ),
        cost_estimate=cost,
    )(zf, cf)

    loss = jnp.sqrt((jnp.sum(partials) + tail_sum) / jnp.float32(total))
    return loss.astype(jnp.result_type(z1.dtype, c1.dtype))


if __name__ == "__main__":
    key = jax.random.PRNGKey(0)
    ks = jax.random.split(key, 8)

    def ref_loss(z, c):
        zf32 = z.astype(jnp.float32)
        cf32 = c.astype(jnp.float32)
        return jnp.sqrt(jnp.mean((zf32 - cf32) ** 2))

    # 1) Small NCHW shape consistent with the module's usage (single block).
    z1 = jax.random.normal(ks[0], (2, 4, 16, 16), dtype=jnp.float32)
    c1 = jax.random.normal(ks[1], (2, 4, 16, 16), dtype=jnp.float32)
    out1 = jax.block_until_ready(svm_loss(z1, c1))
    assert jnp.allclose(out1, ref_loss(z1, c1), rtol=1e-5, atol=1e-6), (out1,)

    # 2) Ragged element count (total % 128 != 0): wrapper lane-tail path.
    z2 = jax.random.normal(ks[2], (3, 5, 13, 17), dtype=jnp.float32)
    c2 = jax.random.normal(ks[3], (3, 5, 13, 17), dtype=jnp.float32)
    out2 = jax.block_until_ready(svm_loss(z2, c2))
    assert jnp.allclose(out2, ref_loss(z2, c2), rtol=1e-5, atol=1e-6), (out2,)

    # 3) Multi-block streaming + 2-way split + clamped-duplicate / ragged-tail
    #    masking, exercised at small size by shrinking the tile/split knobs.
    z3 = jax.random.normal(ks[4], (7, 10, 128), dtype=jnp.float32)   # 70 rows
    c3 = jax.random.normal(ks[5], (7, 10, 128), dtype=jnp.float32)
    out3 = jax.block_until_ready(
        svm_loss(z3, c3, tile_bytes=8 * LANES * 4, split_min_bytes=0))
    assert jnp.allclose(out3, ref_loss(z3, c3), rtol=1e-5, atol=1e-6), (out3,)

    # 4) bf16 inputs: native-dtype streaming with f32 in-kernel accumulation.
    z4 = jax.random.normal(ks[6], (2, 8, 32, 32), dtype=jnp.bfloat16)
    c4 = jax.random.normal(ks[7], (2, 8, 32, 32), dtype=jnp.bfloat16)
    out4 = jax.block_until_ready(svm_loss(z4, c4))
    assert jnp.allclose(out4.astype(jnp.float32), ref_loss(z4, c4),
                        rtol=2e-2, atol=2e-2), (out4,)

    print("KERNEL_OK")
</pallas_src>

<mosaic_0001>
module attributes {stable_mosaic.version = 11 : i64} {
  func.func @_rmse_partial_kernel(%arg0: i32, %arg1: i32, %arg2: memref<16x128xf32, #tpu.memory_space<vmem>>, %arg3: memref<16x128xf32, #tpu.memory_space<vmem>>, %arg4: memref<1x8x128xf32, #tpu.memory_space<vmem>>, %arg5: memref<8x128xf32, #tpu.memory_space<vmem>>) attributes {dimension_semantics = [#tpu.dimension_semantics<parallel>, #tpu.dimension_semantics<arbitrary>], iteration_bounds = array<i64: 1, 1>, scalar_prefetch = 0 : i64, scratch_operands = 1 : i64, tpu.core_type = #tpu.core_type<tc>, window_params = [{transform_indices = @transform_0, window_bounds = array<i64: 16, 128>}, {transform_indices = @transform_1, window_bounds = array<i64: 16, 128>}, {transform_indices = @transform_2, window_bounds = array<i64: 1, 8, 128>}]} {
    %c0_i32 = arith.constant 0 : i32
    %0 = arith.cmpi eq, %arg1, %c0_i32 : i32
    %1 = arith.extui %0 : i1 to i32
    %c0_i32_0 = arith.constant 0 : i32
    %2 = arith.cmpi ne, %1, %c0_i32_0 : i32
    scf.if %2 {
      %cst_10 = arith.constant 0.000000e+00 : f32
      %15 = vector.broadcast %cst_10 : f32 to vector<8x128xf32>
      %c0_11 = arith.constant 0 : index
      %c0_12 = arith.constant 0 : index
      %16 = vector.load %arg5[%c0_11, %c0_12] : memref<8x128xf32, #tpu.memory_space<vmem>>, vector<8x128xf32>
      tpu.vector_store %arg5[%c0_11, %c0_12], %15 {strides = array<i32>} : memref<8x128xf32, #tpu.memory_space<vmem>>, vector<8x128xf32>,
    } else {
    }
    %c0 = arith.constant 0 : index
    %c0_1 = arith.constant 0 : index
    %3 = vector.load %arg2[%c0, %c0_1] : memref<16x128xf32, #tpu.memory_space<vmem>>, vector<16x128xf32>
    %c0_2 = arith.constant 0 : index
    %c0_3 = arith.constant 0 : index
    %4 = vector.load %arg3[%c0_2, %c0_3] : memref<16x128xf32, #tpu.memory_space<vmem>>, vector<16x128xf32>
    %5 = arith.subf %3, %4 : vector<16x128xf32>
    %6 = arith.mulf %5, %5 : vector<16x128xf32>
    %c0_4 = arith.constant 0 : index
    %c0_5 = arith.constant 0 : index
    %7 = vector.load %arg5[%c0_4, %c0_5] : memref<8x128xf32, #tpu.memory_space<vmem>>, vector<8x128xf32>
    %8 = vector.shape_cast %6 : vector<16x128xf32> to vector<2x8x128xf32>
    %cst = arith.constant dense<0.000000e+00> : vector<8x128xf32>
    %9 = vector.multi_reduction <add>, %8, %cst [0] : vector<2x8x128xf32> to vector<8x128xf32>
    %10 = arith.addf %7, %9 : vector<8x128xf32>
    %c0_6 = arith.constant 0 : index
    %c0_7 = arith.constant 0 : index
    %11 = vector.load %arg5[%c0_6, %c0_7] : memref<8x128xf32, #tpu.memory_space<vmem>>, vector<8x128xf32>
    tpu.vector_store %arg5[%c0_6, %c0_7], %10 {strides = array<i32>} : memref<8x128xf32, #tpu.memory_space<vmem>>, vector<8x128xf32>,
    %c0_i32_8 = arith.constant 0 : i32
    %12 = arith.cmpi eq, %arg1, %c0_i32_8 : i32
    %13 = arith.extui %12 : i1 to i32
    %c0_i32_9 = arith.constant 0 : i32
    %14 = arith.cmpi ne, %13, %c0_i32_9 : i32
    scf.if %14 {
      %c0_10 = arith.constant 0 : index
      %c0_11 = arith.constant 0 : index
      %15 = vector.load %arg5[%c0_10, %c0_11] : memref<8x128xf32, #tpu.memory_space<vmem>>, vector<8x128xf32>
      %c0_12 = arith.constant 0 : index
      %c0_13 = arith.constant 0 : index
      %c0_14 = arith.constant 0 : index
      %16 = vector.load %arg4[%c0_12, %c0_13, %c0_14] : memref<1x8x128xf32, #tpu.memory_space<vmem>>, vector<1x8x128xf32>
      %17 = vector.shape_cast %16 : vector<1x8x128xf32> to vector<8x128xf32>
      %18 = vector.shape_cast %15 : vector<8x128xf32> to vector<1x8x128xf32>
      tpu.vector_store %arg4[%c0_12, %c0_13, %c0_14], %18 {strides = array<i32>} : memref<1x8x128xf32, #tpu.memory_space<vmem>>, vector<1x8x128xf32>,
    } else {
    }
    return
  }
  func.func @transform_0(%arg0: i32, %arg1: i32) -> (i32, i32) {
    %c1_i32 = arith.constant 1 : i32
    %0 = arith.muli %arg0, %c1_i32 : i32
    %1 = arith.addi %0, %arg1 : i32
    %c0_i32 = arith.constant 0 : i32
    %2 = arith.minsi %1, %c0_i32 : i32
    %c0_i32_0 = arith.constant 0 : i32
    %c0_i32_1 = arith.constant 0 : i32
    return %2, %c0_i32_0 : i32, i32
  }
  func.func @transform_1(%arg0: i32, %arg1: i32) -> (i32, i32) {
    %c1_i32 = arith.constant 1 : i32
    %0 = arith.muli %arg0, %c1_i32 : i32
    %1 = arith.addi %0, %arg1 : i32
    %c0_i32 = arith.constant 0 : i32
    %2 = arith.minsi %1, %c0_i32 : i32
    %c0_i32_0 = arith.constant 0 : i32
    %c0_i32_1 = arith.constant 0 : i32
    return %2, %c0_i32_0 : i32, i32
  }
  func.func @transform_2(%arg0: i32, %arg1: i32) -> (i32, i32, i32) {
    %c0_i32 = arith.constant 0 : i32
    %c0_i32_0 = arith.constant 0 : i32
    %c0_i32_1 = arith.constant 0 : i32
    return %arg0, %c0_i32, %c0_i32_0 : i32, i32, i32
  }
}

</mosaic_0001>

<bundles_post_ra>
// kernel: tpu_custom_call.1
= control target key start
LH: loop header
LB: loop body
LE: loop exit
PB: predicated region body
PF: predicated region fallthrough
CT: control target
= control target key end

     0   :  { %7 = vsyncpa [#allocation4], 0  ;;  %s220_s0 = inlined_call_operand.hbm [shape: f32[16,128], index: 0, kind: input, shape index: {}]   ;;  %s221_s1 = inlined_call_operand.hbm [shape: f32[16,128], index: 1, kind: input, shape index: {}]   ;;  %s222_s2 = inlined_call_operand.hbm [shape: f32[1,8,128], index: 2, kind: output, shape index: {}]  }
   0x1   :  { %8 = vsyncpa [#allocation7], 0 }
   0x2   :  { %9 = vsyncpa [#allocation5], 0  ;;  %s20_s11 = sshll.u32 %s220_s0, 4  ;;  %s191_s12 = smov [#allocation3]   ;;  %s21_s11 = int_to_ptr.hbm [resolvable:$true] %s20_s11 }
   0x3   :  { %s22_s13 = sshll.u32 %s191_s12, 4  ;;  %s39_s16 = sshll.u32 %s221_s1, 4  ;;  %s23_s13 = int_to_ptr.vmem [resolvable:$true] %s22_s13  ;;  %s40_s16 = int_to_ptr.hbm [resolvable:$true] %s39_s16 }
   0x4   :  { %s192_s17 = smov 128   ;;  %s193_s18 = smov 8  }
   0x5   :  { %28 = dma.hbm_to_vmem [thread:$0]  %s21_s11, 256, %s23_s13, [#allocation4], %s192_s17, %s192_s17, %s193_s18  }
   0x6   :  { %s194_s19 = smov [#allocation6]  }
   0x7   :  { %s41_s20 = sshll.u32 %s194_s19, 4  ;;  %s42_s20 = int_to_ptr.vmem [resolvable:$true] %s41_s20 }
   0x8   :  { %47 = dma.hbm_to_vmem [thread:$0]  %s40_s16, 256, %s42_s20, [#allocation7], %s192_s17, %s192_s17, %s193_s18  }
   0x9   :  { %185 = dma.done.wait [#allocation4], 256  }
   0xa   :  { %186 = vsyncadd [#allocation4], 4294967040 }
   0xb   :  { %187 = dma.done.wait [#allocation7], 256  }
   0xc   :  { %188 = vsyncadd [#allocation7], 4294967040  ;;  %v69_v0 = vld [vmem:[#allocation3] sm:$0xff]  ;;  %v70_v1 = vld [vmem:[#allocation3 + $0x8] sm:$0xff]  ;;  %s195_s0 = smov [#allocation8]   ;;  %s93_s23 = sshll.u32 %s222_s2, 4  ;;  %s94_s23 = int_to_ptr.hbm [resolvable:$true] %s93_s23 }
   0xd   :  { %v71_v2 = vld [vmem:[#allocation6] sm:$0xff]  ;;  %v72_v3 = vld [vmem:[#allocation6 + $0x8] sm:$0xff]  ;;  %s91_s1 = sshll.u32 %s195_s0, 4  ;;  %s92_s1 = int_to_ptr.vmem [resolvable:$true] %s91_s1 }
   0xe   :  { %v73_v4 = vsub.f32 %v69_v0, %v71_v2  ;;  %v74_v5 = vsub.f32 %v70_v1, %v72_v3 }
  0x10   :  { %v75_v6 = vmul.f32 %v73_v4, %v73_v4  ;;  %v76_v7 = vmul.f32 %v74_v5, %v74_v5 }
  0x12   :  { %v78_v8 = vadd.f32 %v76_v7, %v75_v6 }
  0x14   :  { %85 = vst [vmem:[#allocation8] sm:$0xff] %v78_v8 }
  0x15   :  { %96 = dma.vmem_to_hbm [thread:$0]  %s92_s1, 128, %s94_s23, [#allocation5]  }
  0x16   :  { %189 = dma.done.wait [#allocation5], 128  }
  0x17   :  { %190 = vsyncadd [#allocation5], 4294967168 }
  0x18   :  { %101 = vsyncpa [#allocation4], 1 }
  0x19   :  { %102 = vsyncpa [#allocation7], 1 }
  0x1a   :  { %103 = vsyncpa [#allocation5], 1 }

</bundles_post_ra>
